<compile_context>
chip_gen: v5e
topology: v5e:2x2
jax: 0.10.0
libtpu: 0.0.40
codegen_flags: <defaults>
</compile_context>

<pallas_src>
import functools
import math

import jax
import jax.numpy as jnp
from jax.experimental import pallas as pl
from jax.experimental.pallas import tpu as pltpu

_LANE = 128


def _round_up(x, m):
    return ((x + m - 1) // m) * m


def _is_dual_tensorcore():
    """True only on chips with 2 TensorCores per chip (v7x-class)."""
    try:
        kind = jax.devices()[0].device_kind.lower().replace(" ", "")
    except Exception:
        return False
    return ("v7" in kind) or ("tpu7" in kind)


def _iou_kernel(x_ref, t_ref, part_ref, *, block_rows, sub_rows,
                tiles_per_core, last_block, boundary_valid, boundary_partial,
                gated):
    i = pl.program_id(1)

    @pl.when(i == 0)
    def _init():
        part_ref[...] = jnp.zeros_like(part_ref)

    def accumulate(masked):
        n_sub = block_rows // sub_rows
        g = sub_rows // 8

        def chunk(k, carry):
            inter_acc, total_acc = carry
            r0 = pl.multiple_of(k * sub_rows, sub_rows)
            x = x_ref[pl.ds(r0, sub_rows), :].astype(jnp.float32)
            t = t_ref[pl.ds(r0, sub_rows), :].astype(jnp.float32)
            # sigmoid(x) = 0.5*tanh(0.5*x) + 0.5 : one EUP push per element.
            s = 0.5 * jnp.tanh(0.5 * x) + 0.5
            inter = s * t
            total = s + t
            if masked:
                # Only the boundary tile runs this path (gated by pl.when).
                # boundary_valid is a static, tile-relative element count.
                row = jax.lax.broadcasted_iota(jnp.int32, (sub_rows, _LANE), 0)
                lane = jax.lax.broadcasted_iota(jnp.int32, (sub_rows, _LANE), 1)
                idx = (r0 + row) * _LANE + lane
                valid = idx < boundary_valid
                inter = jnp.where(valid, inter, 0.0)
                total = jnp.where(valid, total, 0.0)
            # Reduce rows only down to (8, 128) sublane/lane partials (pure
            # VPU adds, no cross-lane XLU work).
            inter_acc = inter_acc + inter.reshape(g, 8, _LANE).sum(axis=0)
            total_acc = total_acc + total.reshape(g, 8, _LANE).sum(axis=0)
            return inter_acc, total_acc

        zero = jnp.zeros((8, _LANE), jnp.float32)
        inter_p, total_p = jax.lax.fori_loop(0, n_sub, chunk, (zero, zero))
        part_ref[0, 0] += inter_p
        part_ref[0, 1] += total_p

    if not gated:
        # Grid covers exactly the valid elements: every tile is the fast path.
        accumulate(masked=False)
    else:
        tile_idx = pl.program_id(0) * tiles_per_core + i

        @pl.when(tile_idx < last_block)
        def _interior():
            accumulate(masked=False)

        @pl.when(tile_idx == last_block)
        def _boundary():
            accumulate(masked=boundary_partial)
        # tile_idx > last_block: clamped duplicate tile -> skip entirely.


def iou_loss(inputs, targets, smooth=1.0, block_rows=8192, num_splits=None):
    """Pallas implementation of IoULoss.forward (returns a scalar f32).

    Inputs may be f32 or bf16; they are streamed in their native dtype and
    cast to f32 inside the kernel (pass bf16 to halve HBM traffic).
    """
    x = inputs.reshape(-1)        # native dtype, no upcast copy
    t = targets.reshape(-1)
    n = x.shape[0]

    is_dual = _is_dual_tensorcore()
    if num_splits is None:
        num_splits = 2 if is_dual else 1

    # Pad (a copy) only when the element count is not lane-aligned (or tiny);
    # padded elements are masked out in-kernel, boundary tile only.
    # TODO(synk): a ragged-tail side-sum / BoundedSlice last block would avoid
    # this copy; segmentation tensors are virtually always 128-aligned.
    n_lanes = max(_round_up(n, _LANE), 8 * _LANE)
    if n_lanes != n:
        x = jnp.pad(x, (0, n_lanes - n))
        t = jnp.pad(t, (0, n_lanes - n))

    rows = n_lanes // _LANE
    x2 = x.reshape(rows, _LANE)   # free reshape (contiguous)
    t2 = t.reshape(rows, _LANE)

    # --- tile sizing: biggest tile within a generation-safe VMEM budget ----
    itemsize = x2.dtype.itemsize + t2.dtype.itemsize
    # Keep the double-buffered input pipeline <= ~24 MiB (fits v7x per-TC).
    budget_rows = (24 << 20) // (2 * _LANE * itemsize)
    block_rows = min(block_rows, budget_rows,
                     _round_up(pl.cdiv(rows, num_splits), 8))
    block_rows = max(8, (block_rows // 8) * 8)
    # Compute chunk size inside a tile (bounds VMEM temporaries / vregs).
    sub_rows = math.gcd(block_rows, 256)

    n_blocks = pl.cdiv(rows, block_rows)
    tiles_per_core = pl.cdiv(n_blocks, num_splits)
    last_block = n_blocks - 1

    has_dup = num_splits * tiles_per_core > n_blocks          # clamped dups
    boundary_valid = n - last_block * block_rows * _LANE       # static int
    boundary_partial = boundary_valid != block_rows * _LANE
    gated = has_dup or boundary_partial                        # static

    def in_map(c, i):
        # Clamp so over-allocated grid steps DMA a valid block (their compute
        # is skipped in-kernel).
        return (jnp.minimum(c * tiles_per_core + i, last_block), 0)

    kernel = functools.partial(
        _iou_kernel, block_rows=block_rows, sub_rows=sub_rows,
        tiles_per_core=tiles_per_core, last_block=last_block,
        boundary_valid=boundary_valid, boundary_partial=boundary_partial,
        gated=gated)

    # Explicit scoped-VMEM limit covering the double-buffered pipeline
    # (2 inputs x 2 buffers) plus headroom; stays within v7x's per-TC budget.
    pipeline_bytes = 2 * block_rows * _LANE * itemsize
    vmem_limit = min(max(pipeline_bytes + (pipeline_bytes >> 2) + (2 << 20),
                         16 << 20), 40 << 20)

    # Core-parallel leading axis only on dual-TC chips with a size-2 split.
    lead_sem = (pltpu.CORE_PARALLEL if (is_dual and num_splits == 2)
                else pltpu.ARBITRARY)

    parts = pl.pallas_call(
        kernel,
        out_shape=jax.ShapeDtypeStruct((num_splits, 2, 8, _LANE), jnp.float32),
        grid_spec=pltpu.PrefetchScalarGridSpec(
            num_scalar_prefetch=0,
            grid=(num_splits, tiles_per_core),
            in_specs=[
                pl.BlockSpec((block_rows, _LANE), in_map),
                pl.BlockSpec((block_rows, _LANE), in_map),
            ],
            out_specs=pl.BlockSpec((1, 2, 8, _LANE),
                                   lambda c, i: (c, 0, 0, 0)),
        ),
        compiler_params=pltpu.CompilerParams(
            dimension_semantics=(lead_sem, pltpu.ARBITRARY),
            vmem_limit_bytes=vmem_limit),
    )(x2, t2)

    inter = jnp.sum(parts[:, 0])
    total = jnp.sum(parts[:, 1])
    union = total - inter
    smooth = jnp.float32(smooth)
    return 1.0 - (inter + smooth) / (union + smooth)


def iou_loss_ref(inputs, targets, smooth=1.0):
    x = jax.nn.sigmoid(inputs.astype(jnp.float32)).reshape(-1)
    t = targets.astype(jnp.float32).reshape(-1)
    inter = jnp.sum(x * t)
    total = jnp.sum(x + t)
    union = total - inter
    return 1.0 - (inter + smooth) / (union + smooth)


def _check(shape, seed, dtype=jnp.float32, **kw):
    k1, k2 = jax.random.split(jax.random.PRNGKey(seed))
    inputs = jax.random.normal(k1, shape, dtype=dtype)
    targets = (jax.random.uniform(k2, shape) > 0.5).astype(dtype)
    loss = jax.block_until_ready(iou_loss(inputs, targets, smooth=1.0, **kw))
    ref = jax.block_until_ready(iou_loss_ref(inputs, targets, smooth=1.0))
    assert jnp.allclose(loss, ref, rtol=1e-5, atol=1e-5), (shape, loss, ref)


if __name__ == "__main__":
    # Small segmentation-like logit/mask pair (NCHW), lane-aligned (fast path).
    _check((2, 4, 16, 16), seed=0)
    # Non-128-aligned element count: exercises boundary-tile masking.
    _check((1, 3, 17, 19), seed=1)
    # Slightly larger: multi-vreg (g > 1) partial accumulation in one tile.
    _check((2, 1, 128, 128), seed=2)
    # Forced multi-tile grid + 2-way split: exercises the interior fast path,
    # the masked boundary tile, and clamped duplicate-tile skipping.
    _check((1, 3, 41, 128), seed=3, block_rows=48, num_splits=2)
    # bf16 inputs streamed natively (half the HBM traffic), cast to f32 in VMEM.
    _check((2, 4, 16, 16), seed=4, dtype=jnp.bfloat16)
    print("KERNEL_OK")
</pallas_src>

<mosaic_0001>
module attributes {stable_mosaic.version = 11 : i64} {
  func.func @_iou_kernel(%arg0: i32, %arg1: i32, %arg2: memref<16x128xf32, #tpu.memory_space<vmem>>, %arg3: memref<16x128xf32, #tpu.memory_space<vmem>>, %arg4: memref<1x2x8x128xf32, #tpu.memory_space<vmem>>) attributes {dimension_semantics = [#tpu.dimension_semantics<arbitrary>, #tpu.dimension_semantics<arbitrary>], iteration_bounds = array<i64: 1, 1>, scalar_prefetch = 0 : i64, scratch_operands = 0 : i64, tpu.core_type = #tpu.core_type<tc>, window_params = [{transform_indices = @transform_0, window_bounds = array<i64: 16, 128>}, {transform_indices = @transform_1, window_bounds = array<i64: 16, 128>}, {transform_indices = @transform_2, window_bounds = array<i64: 1, 2, 8, 128>}]} {
    %c0_i32 = arith.constant 0 : i32
    %0 = arith.cmpi eq, %arg1, %c0_i32 : i32
    %1 = arith.extui %0 : i1 to i32
    %c0_i32_0 = arith.constant 0 : i32
    %2 = arith.cmpi ne, %1, %c0_i32_0 : i32
    scf.if %2 {
      %cst_23 = arith.constant 0.000000e+00 : f32
      %37 = vector.broadcast %cst_23 : f32 to vector<1x2x8x128xf32>
      %c0_24 = arith.constant 0 : index
      %c0_25 = arith.constant 0 : index
      %c0_26 = arith.constant 0 : index
      %c0_27 = arith.constant 0 : index
      %38 = vector.load %arg4[%c0_24, %c0_25, %c0_26, %c0_27] : memref<1x2x8x128xf32, #tpu.memory_space<vmem>>, vector<1x2x8x128xf32>
      tpu.vector_store %arg4[%c0_24, %c0_25, %c0_26, %c0_27], %37 {strides = array<i32>} : memref<1x2x8x128xf32, #tpu.memory_space<vmem>>, vector<1x2x8x128xf32>,
    } else {
    }
    %cst = arith.constant 0.000000e+00 : f32
    %3 = vector.broadcast %cst : f32 to vector<8x128xf32>
    %c0_i32_1 = arith.constant 0 : i32
    %c16_i32 = arith.constant 16 : i32
    %4 = arith.muli %c0_i32_1, %c16_i32 : i32
    %5 = tpu.assume_multiple %4, 16 : i32
    %6 = arith.index_cast %5 : i32 to index
    %c0 = arith.constant 0 : index
    %7 = vector.load %arg2[%6, %c0] : memref<16x128xf32, #tpu.memory_space<vmem>>, vector<16x128xf32>
    %8 = arith.index_cast %5 : i32 to index
    %c0_2 = arith.constant 0 : index
    %9 = vector.load %arg3[%8, %c0_2] : memref<16x128xf32, #tpu.memory_space<vmem>>, vector<16x128xf32>
    %cst_3 = arith.constant 5.000000e-01 : f32
    %10 = vector.broadcast %cst_3 : f32 to vector<16x128xf32>
    %11 = arith.mulf %10, %7 : vector<16x128xf32>
    %12 = math.tanh %11 : vector<16x128xf32>
    %cst_4 = arith.constant 5.000000e-01 : f32
    %13 = vector.broadcast %cst_4 : f32 to vector<16x128xf32>
    %14 = arith.mulf %13, %12 : vector<16x128xf32>
    %cst_5 = arith.constant 5.000000e-01 : f32
    %15 = vector.broadcast %cst_5 : f32 to vector<16x128xf32>
    %16 = arith.addf %14, %15 : vector<16x128xf32>
    %17 = arith.mulf %16, %9 : vector<16x128xf32>
    %18 = arith.addf %16, %9 : vector<16x128xf32>
    %19 = vector.shape_cast %17 : vector<16x128xf32> to vector<2x8x128xf32>
    %cst_6 = arith.constant dense<0.000000e+00> : vector<8x128xf32>
    %20 = vector.multi_reduction <add>, %19, %cst_6 [0] : vector<2x8x128xf32> to vector<8x128xf32>
    %21 = arith.addf %3, %20 : vector<8x128xf32>
    %22 = vector.shape_cast %18 : vector<16x128xf32> to vector<2x8x128xf32>
    %cst_7 = arith.constant dense<0.000000e+00> : vector<8x128xf32>
    %23 = vector.multi_reduction <add>, %22, %cst_7 [0] : vector<2x8x128xf32> to vector<8x128xf32>
    %24 = arith.addf %3, %23 : vector<8x128xf32>
    %c1_i32 = arith.constant 1 : i32
    %c0_8 = arith.constant 0 : index
    %c0_9 = arith.constant 0 : index
    %c0_10 = arith.constant 0 : index
    %c0_11 = arith.constant 0 : index
    %25 = vector.load %arg4[%c0_8, %c0_9, %c0_10, %c0_11] : memref<1x2x8x128xf32, #tpu.memory_space<vmem>>, vector<1x1x8x128xf32>
    %26 = vector.shape_cast %25 : vector<1x1x8x128xf32> to vector<8x128xf32>
    %27 = arith.addf %26, %21 : vector<8x128xf32>
    %c0_12 = arith.constant 0 : index
    %c0_13 = arith.constant 0 : index
    %c0_14 = arith.constant 0 : index
    %c0_15 = arith.constant 0 : index
    %28 = vector.load %arg4[%c0_12, %c0_13, %c0_14, %c0_15] : memref<1x2x8x128xf32, #tpu.memory_space<vmem>>, vector<1x1x8x128xf32>
    %29 = vector.shape_cast %28 : vector<1x1x8x128xf32> to vector<8x128xf32>
    %30 = vector.shape_cast %27 : vector<8x128xf32> to vector<1x1x8x128xf32>
    tpu.vector_store %arg4[%c0_12, %c0_13, %c0_14, %c0_15], %30 {strides = array<i32>} : memref<1x2x8x128xf32, #tpu.memory_space<vmem>>, vector<1x1x8x128xf32>,
    %c0_16 = arith.constant 0 : index
    %c1 = arith.constant 1 : index
    %c0_17 = arith.constant 0 : index
    %c0_18 = arith.constant 0 : index
    %31 = vector.load %arg4[%c0_16, %c1, %c0_17, %c0_18] : memref<1x2x8x128xf32, #tpu.memory_space<vmem>>, vector<1x1x8x128xf32>
    %32 = vector.shape_cast %31 : vector<1x1x8x128xf32> to vector<8x128xf32>
    %33 = arith.addf %32, %24 : vector<8x128xf32>
    %c0_19 = arith.constant 0 : index
    %c1_20 = arith.constant 1 : index
    %c0_21 = arith.constant 0 : index
    %c0_22 = arith.constant 0 : index
    %34 = vector.load %arg4[%c0_19, %c1_20, %c0_21, %c0_22] : memref<1x2x8x128xf32, #tpu.memory_space<vmem>>, vector<1x1x8x128xf32>
    %35 = vector.shape_cast %34 : vector<1x1x8x128xf32> to vector<8x128xf32>
    %36 = vector.shape_cast %33 : vector<8x128xf32> to vector<1x1x8x128xf32>
    tpu.vector_store %arg4[%c0_19, %c1_20, %c0_21, %c0_22], %36 {strides = array<i32>} : memref<1x2x8x128xf32, #tpu.memory_space<vmem>>, vector<1x1x8x128xf32>,
    return
  }
  func.func @transform_0(%arg0: i32, %arg1: i32) -> (i32, i32) {
    %c1_i32 = arith.constant 1 : i32
    %0 = arith.muli %arg0, %c1_i32 : i32
    %1 = arith.addi %0, %arg1 : i32
    %c0_i32 = arith.constant 0 : i32
    %2 = arith.minsi %1, %c0_i32 : i32
    %c0_i32_0 = arith.constant 0 : i32
    %c0_i32_1 = arith.constant 0 : i32
    return %2, %c0_i32_0 : i32, i32
  }
  func.func @transform_1(%arg0: i32, %arg1: i32) -> (i32, i32) {
    %c1_i32 = arith.constant 1 : i32
    %0 = arith.muli %arg0, %c1_i32 : i32
    %1 = arith.addi %0, %arg1 : i32
    %c0_i32 = arith.constant 0 : i32
    %2 = arith.minsi %1, %c0_i32 : i32
    %c0_i32_0 = arith.constant 0 : i32
    %c0_i32_1 = arith.constant 0 : i32
    return %2, %c0_i32_0 : i32, i32
  }
  func.func @transform_2(%arg0: i32, %arg1: i32) -> (i32, i32, i32, i32) {
    %c0_i32 = arith.constant 0 : i32
    %c0_i32_0 = arith.constant 0 : i32
    %c0_i32_1 = arith.constant 0 : i32
    %c0_i32_2 = arith.constant 0 : i32
    return %arg0, %c0_i32, %c0_i32_0, %c0_i32_1 : i32, i32, i32, i32
  }
}

</mosaic_0001>

<bundles_post_ra>
// kernel: tpu_custom_call.1
= control target key start
LH: loop header
LB: loop body
LE: loop exit
PB: predicated region body
PF: predicated region fallthrough
CT: control target
= control target key end

     0   :  { %7 = vsyncpa [#allocation3], 0  ;;  %s247_s0 = inlined_call_operand.hbm [shape: f32[16,128], index: 0, kind: input, shape index: {}]   ;;  %s248_s1 = inlined_call_operand.hbm [shape: f32[16,128], index: 1, kind: input, shape index: {}]   ;;  %s249_s2 = inlined_call_operand.hbm [shape: f32[1,2,8,128], index: 2, kind: output, shape index: {}]  }
   0x1   :  { %8 = vsyncpa [#allocation6], 0 }
   0x2   :  { %9 = vsyncpa [#allocation4], 0  ;;  %s20_s11 = sshll.u32 %s247_s0, 4  ;;  %s209_s12 = smov [#allocation2]   ;;  %s21_s11 = int_to_ptr.hbm [resolvable:$true] %s20_s11 }
   0x3   :  { %s22_s13 = sshll.u32 %s209_s12, 4  ;;  %s39_s16 = sshll.u32 %s248_s1, 4  ;;  %s23_s13 = int_to_ptr.vmem [resolvable:$true] %s22_s13  ;;  %s40_s16 = int_to_ptr.hbm [resolvable:$true] %s39_s16 }
   0x4   :  { %s210_s17 = smov 128   ;;  %s211_s18 = smov 8  }
   0x5   :  { %28 = dma.hbm_to_vmem [thread:$0]  %s21_s11, 256, %s23_s13, [#allocation3], %s210_s17, %s210_s17, %s211_s18  }
   0x6   :  { %s212_s19 = smov [#allocation5]  }
   0x7   :  { %s41_s20 = sshll.u32 %s212_s19, 4  ;;  %s42_s20 = int_to_ptr.vmem [resolvable:$true] %s41_s20 }
   0x8   :  { %47 = dma.hbm_to_vmem [thread:$0]  %s40_s16, 256, %s42_s20, [#allocation6], %s210_s17, %s210_s17, %s211_s18  }
   0x9   :  { %203 = dma.done.wait [#allocation3], 256  }
   0xa   :  { %204 = vsyncadd [#allocation3], 4294967040 }
   0xb   :  { %205 = dma.done.wait [#allocation6], 256  }
   0xc   :  { %206 = vsyncadd [#allocation6], 4294967040  ;;  %v70_v0 = vld [vmem:[#allocation2] sm:$0xff]  ;;  %v71_v1 = vld [vmem:[#allocation2 + $0x8] sm:$0xff]  ;;  %s213_s0 = smov [#allocation7]   ;;  %s103_s23 = sshll.u32 %s249_s2, 4  ;;  %s104_s23 = int_to_ptr.hbm [resolvable:$true] %s103_s23 }
   0xd   :  { %v74_v2 = vmul.f32 0.5, %v70_v0  ;;  %v75_v3 = vmul.f32 0.5, %v71_v1  ;;  %v72_v7 = vld [vmem:[#allocation5] sm:$0xff]  ;;  %v73_v9 = vld [vmem:[#allocation5 + $0x8] sm:$0xff]  ;;  %s101_s1 = sshll.u32 %s213_s0, 4  ;;  %s102_s1 = int_to_ptr.vmem [resolvable:$true] %s101_s1 }
   0xf   :  { %127 = vtanh.f32 %v74_v2 }
  0x10   :  { %129 = vtanh.f32 %v75_v3 }
  0x15   :  { %v128_v4 = vpop.eup %127 }
  0x16   :  { %v130_v5 = vpop.eup %129  ;;  %v78_v6 = vmul.f32 0.5, %v128_v4 }
  0x17   :  { %v79_v8 = vmul.f32 0.5, %v130_v5 }
  0x18   :  { %v80_v10 = vadd.f32 0.5, %v78_v6 }
  0x19   :  { %v81_v11 = vadd.f32 0.5, %v79_v8 }
  0x1a   :  { %v82_v12 = vmul.f32 %v80_v10, %v72_v7  ;;  %v84_v13 = vadd.f32 %v80_v10, %v72_v7 }
  0x1b   :  { %v83_v14 = vmul.f32 %v81_v11, %v73_v9  ;;  %v85_v15 = vadd.f32 %v81_v11, %v73_v9 }
  0x1d   :  { %v86_v16 = vadd.f32 %v83_v14, %v82_v12  ;;  %v88_v17 = vadd.f32 %v85_v15, %v84_v13 }
  0x1f   :  { %92 = vst [vmem:[#allocation7] sm:$0xff] %v86_v16 }
  0x20   :  { %96 = vst [vmem:[#allocation7 + $0x8] sm:$0xff] %v88_v17 }
  0x21   :  { %109 = dma.vmem_to_hbm [thread:$0]  %s102_s1, 256, %s104_s23, [#allocation4], %s210_s17, %s210_s17, %s211_s18  }
  0x22   :  { %207 = dma.done.wait [#allocation4], 256  }
  0x23   :  { %208 = vsyncadd [#allocation4], 4294967040 }
  0x24   :  { %114 = vsyncpa [#allocation3], 1 }
  0x25   :  { %115 = vsyncpa [#allocation6], 1 }
  0x26   :  { %116 = vsyncpa [#allocation4], 1 }

</bundles_post_ra>
